<compile_context>
chip_gen: v7x
topology: tpu7x:2x2x1
jax: 0.10.0
libtpu: 0.0.40
codegen_flags: <defaults>
</compile_context>

<pallas_src>
import jax
import jax.numpy as jnp
from jax.experimental import pallas as pl
from jax.experimental.pallas import tpu as pltpu


def _round_up(x: int, m: int) -> int:
    return (x + m - 1) // m * m


def maxout_kernel(x_ref, w_ref, b_ref, o_ref, acc_ref):
    k = pl.program_id(2)

    @pl.when(k == 0)
    def _():
        acc_ref[...] = jnp.zeros_like(acc_ref)

    # One fused MXU matmul per step: (tm, tk) @ (tk, 2*tn) -> f32 accumulator.
    acc_ref[...] += jnp.dot(
        x_ref[...], w_ref[...], preferred_element_type=jnp.float32
    )

    @pl.when(k == pl.num_programs(2) - 1)
    def _():
        acc = acc_ref[...] + b_ref[...]
        tn = o_ref.shape[-1]          # both halves are 128-aligned lane slices
        o_ref[...] = jnp.maximum(acc[:, :tn], acc[:, tn:]).astype(o_ref.dtype)


def maxout(x, w1, b1, w2, b2, *, tm=256, tn=256, tk=512):
    """x: (batch, seq, input_size); w*: (input_size, hidden); b*: (hidden,).

    Computes max(x @ w1 + b1, x @ w2 + b2), i.e. PyTorch MaxOut with weights
    passed pre-transposed relative to nn.Linear.weight.
    """
    batch, seq, in_size = x.shape
    hidden = w1.shape[1]
    M = batch * seq

    # --- tile sizing ---------------------------------------------------------
    tm = min(tm, _round_up(M, 8))            # large row tile, but no huge waste
    Hp = _round_up(hidden, 128)              # lane-dense output (per half)
    if Hp % tn != 0:
        tn = 128
    if in_size <= tk:                        # small K: single, full K block
        Kp = _round_up(in_size, 8)
        tk = Kp
    else:                                    # large K: stream K in 512 chunks
        Kp = _round_up(in_size, tk)
    Mp = _round_up(M, tm)

    n_tiles = Hp // tn
    grid = (Mp // tm, n_tiles, Kp // tk)

    # --- pad & fuse operands -------------------------------------------------
    x2d = jnp.pad(x.reshape(M, in_size), ((0, Mp - M), (0, Kp - in_size)))

    def pad_w(w):
        return jnp.pad(w, ((0, Kp - in_size), (0, Hp - hidden)))

    w1p, w2p = pad_w(w1), pad_w(w2)
    b1p = jnp.pad(b1, (0, Hp - hidden)).reshape(1, Hp)
    b2p = jnp.pad(b2, (0, Hp - hidden)).reshape(1, Hp)

    # Per-N-tile interleave: columns [W1 tile j | W2 tile j] are contiguous, so
    # each grid step loads one (tk, 2*tn) fused block and does one matmul.
    w_fused = jnp.concatenate(
        [w1p.reshape(Kp, n_tiles, tn), w2p.reshape(Kp, n_tiles, tn)], axis=2
    ).reshape(Kp, 2 * Hp)
    b_fused = jnp.concatenate(
        [b1p.reshape(1, n_tiles, tn), b2p.reshape(1, n_tiles, tn)], axis=2
    ).reshape(1, 2 * Hp)

    # --- explicit VMEM budget (double-buffered tiles + f32 accumulator) ------
    tile_bytes = 4 * (tm * tk + tk * 2 * tn + 2 * tn + tm * tn)
    vmem_limit = int(min(56 * 2**20, max(32 * 2**20,
                                         2 * tile_bytes + 4 * tm * 2 * tn + 2**20)))

    out = pl.pallas_call(
        maxout_kernel,
        out_shape=jax.ShapeDtypeStruct((Mp, Hp), x.dtype),
        grid_spec=pltpu.PrefetchScalarGridSpec(
            num_scalar_prefetch=0,
            grid=grid,
            in_specs=[
                pl.BlockSpec((tm, tk), lambda i, j, k: (i, k)),        # x tile
                pl.BlockSpec((tk, 2 * tn), lambda i, j, k: (k, j)),    # fused W
                pl.BlockSpec((1, 2 * tn), lambda i, j, k: (0, j)),     # fused b
            ],
            out_specs=pl.BlockSpec((tm, tn), lambda i, j, k: (i, j)),
            scratch_shapes=[pltpu.VMEM((tm, 2 * tn), jnp.float32)],
        ),
        compiler_params=pltpu.CompilerParams(
            dimension_semantics=("parallel", "parallel", "arbitrary"),
            vmem_limit_bytes=vmem_limit,
        ),
    )(x2d, w_fused, b_fused)

    return out[:M, :hidden].reshape(batch, seq, hidden)


def maxout_ref(x, w1, b1, w2, b2):
    f1 = jnp.einsum("bsk,kh->bsh", x, w1) + b1
    f2 = jnp.einsum("bsk,kh->bsh", x, w2) + b2
    return jnp.maximum(f1, f2)


if __name__ == "__main__":
    # Small shapes consistent with MaxOut(input_size=32, hidden_size=32)
    batch, seq, input_size, hidden_size = 2, 8, 32, 32

    key = jax.random.PRNGKey(0)
    kx, kw1, kb1, kw2, kb2 = jax.random.split(key, 5)

    # Deterministic init mimicking nn.Linear's uniform(-1/sqrt(in), 1/sqrt(in))
    bound = 1.0 / (input_size ** 0.5)
    x = jax.random.normal(kx, (batch, seq, input_size), dtype=jnp.float32)
    w1 = jax.random.uniform(kw1, (input_size, hidden_size), jnp.float32, -bound, bound)
    b1 = jax.random.uniform(kb1, (hidden_size,), jnp.float32, -bound, bound)
    w2 = jax.random.uniform(kw2, (input_size, hidden_size), jnp.float32, -bound, bound)
    b2 = jax.random.uniform(kb2, (hidden_size,), jnp.float32, -bound, bound)

    out = maxout(x, w1, b1, w2, b2)
    out = jax.block_until_ready(out)

    ref = maxout_ref(x, w1, b1, w2, b2)
    assert out.shape == (batch, seq, hidden_size)
    assert jnp.allclose(out, ref, atol=1e-5, rtol=1e-5)

    print("KERNEL_OK")
</pallas_src>

<mosaic_0001>
module attributes {stable_mosaic.version = 11 : i64} {
  func.func @maxout_kernel(%arg0: i32, %arg1: i32, %arg2: i32, %arg3: memref<16x32xf32, #tpu.memory_space<vmem>>, %arg4: memref<32x256xf32, #tpu.memory_space<vmem>>, %arg5: memref<1x256xf32, #tpu.memory_space<vmem>>, %arg6: memref<16x128xf32, #tpu.memory_space<vmem>>, %arg7: memref<16x256xf32, #tpu.memory_space<vmem>>) attributes {dimension_semantics = [#tpu.dimension_semantics<parallel>, #tpu.dimension_semantics<parallel>, #tpu.dimension_semantics<arbitrary>], iteration_bounds = array<i64: 1, 1, 1>, scalar_prefetch = 0 : i64, scratch_operands = 1 : i64, tpu.core_type = #tpu.core_type<tc>, window_params = [{transform_indices = @transform_0, window_bounds = array<i64: 16, 32>}, {transform_indices = @transform_1, window_bounds = array<i64: 32, 256>}, {transform_indices = @transform_2, window_bounds = array<i64: 1, 256>}, {transform_indices = @transform_3, window_bounds = array<i64: 16, 128>}]} {
    %c0_i32 = arith.constant 0 : i32
    %0 = arith.cmpi eq, %arg2, %c0_i32 : i32
    %1 = arith.extui %0 : i1 to i32
    %c0_i32_0 = arith.constant 0 : i32
    %2 = arith.cmpi ne, %1, %c0_i32_0 : i32
    scf.if %2 {
      %cst_10 = arith.constant 0.000000e+00 : f32
      %12 = vector.broadcast %cst_10 : f32 to vector<16x256xf32>
      %c0_11 = arith.constant 0 : index
      %c0_12 = arith.constant 0 : index
      %13 = vector.load %arg7[%c0_11, %c0_12] : memref<16x256xf32, #tpu.memory_space<vmem>>, vector<16x256xf32>
      tpu.vector_store %arg7[%c0_11, %c0_12], %12 {strides = array<i32>} : memref<16x256xf32, #tpu.memory_space<vmem>>, vector<16x256xf32>,
    } else {
    }
    %c0 = arith.constant 0 : index
    %c0_1 = arith.constant 0 : index
    %3 = vector.load %arg7[%c0, %c0_1] : memref<16x256xf32, #tpu.memory_space<vmem>>, vector<16x256xf32>
    %c0_2 = arith.constant 0 : index
    %c0_3 = arith.constant 0 : index
    %4 = vector.load %arg3[%c0_2, %c0_3] : memref<16x32xf32, #tpu.memory_space<vmem>>, vector<16x32xf32>
    %c0_4 = arith.constant 0 : index
    %c0_5 = arith.constant 0 : index
    %5 = vector.load %arg4[%c0_4, %c0_5] : memref<32x256xf32, #tpu.memory_space<vmem>>, vector<32x256xf32>
    %cst = arith.constant dense<0.000000e+00> : vector<16x256xf32>
    %6 = tpu.matmul %4, %5, %cst {dimension_numbers = #tpu.dot_dimension_numbers<[1], [0], [0], [1], [0, 0, 1, 1], [], []>} : vector<16x32xf32>, vector<32x256xf32>, vector<16x256xf32> -> vector<16x256xf32>
    %7 = arith.addf %3, %6 : vector<16x256xf32>
    %c0_6 = arith.constant 0 : index
    %c0_7 = arith.constant 0 : index
    %8 = vector.load %arg7[%c0_6, %c0_7] : memref<16x256xf32, #tpu.memory_space<vmem>>, vector<16x256xf32>
    tpu.vector_store %arg7[%c0_6, %c0_7], %7 {strides = array<i32>} : memref<16x256xf32, #tpu.memory_space<vmem>>, vector<16x256xf32>,
    %c0_i32_8 = arith.constant 0 : i32
    %9 = arith.cmpi eq, %arg2, %c0_i32_8 : i32
    %10 = arith.extui %9 : i1 to i32
    %c0_i32_9 = arith.constant 0 : i32
    %11 = arith.cmpi ne, %10, %c0_i32_9 : i32
    scf.if %11 {
      %c0_10 = arith.constant 0 : index
      %c0_11 = arith.constant 0 : index
      %12 = vector.load %arg7[%c0_10, %c0_11] : memref<16x256xf32, #tpu.memory_space<vmem>>, vector<16x256xf32>
      %c0_12 = arith.constant 0 : index
      %c0_13 = arith.constant 0 : index
      %13 = vector.load %arg5[%c0_12, %c0_13] : memref<1x256xf32, #tpu.memory_space<vmem>>, vector<1x256xf32>
      %14 = vector.broadcast %13 : vector<1x256xf32> to vector<16x256xf32>
      %15 = arith.addf %12, %14 : vector<16x256xf32>
      %16 = vector.extract_strided_slice %15 {offsets = [0, 0], sizes = [16, 128], strides = [1, 1]} : vector<16x256xf32> to vector<16x128xf32>
      %17 = vector.extract_strided_slice %15 {offsets = [0, 128], sizes = [16, 128], strides = [1, 1]} : vector<16x256xf32> to vector<16x128xf32>
      %18 = arith.maximumf %16, %17 : vector<16x128xf32>
      %c0_14 = arith.constant 0 : index
      %c0_15 = arith.constant 0 : index
      %19 = vector.load %arg6[%c0_14, %c0_15] : memref<16x128xf32, #tpu.memory_space<vmem>>, vector<16x128xf32>
      tpu.vector_store %arg6[%c0_14, %c0_15], %18 {strides = array<i32>} : memref<16x128xf32, #tpu.memory_space<vmem>>, vector<16x128xf32>,
    } else {
    }
    return
  }
  func.func @transform_0(%arg0: i32, %arg1: i32, %arg2: i32) -> (i32, i32) {
    %c0_i32 = arith.constant 0 : i32
    return %arg0, %arg2 : i32, i32
  }
  func.func @transform_1(%arg0: i32, %arg1: i32, %arg2: i32) -> (i32, i32) {
    %c0_i32 = arith.constant 0 : i32
    return %arg2, %arg1 : i32, i32
  }
  func.func @transform_2(%arg0: i32, %arg1: i32, %arg2: i32) -> (i32, i32) {
    %c0_i32 = arith.constant 0 : i32
    %c0_i32_0 = arith.constant 0 : i32
    return %c0_i32, %arg1 : i32, i32
  }
  func.func @transform_3(%arg0: i32, %arg1: i32, %arg2: i32) -> (i32, i32) {
    %c0_i32 = arith.constant 0 : i32
    return %arg0, %arg1 : i32, i32
  }
}

</mosaic_0001>

<bundles_post_ra>
// kernel: tpu_custom_call.1
= control target key start
LH: loop header
LB: loop body
LE: loop exit
PB: predicated region body
PF: predicated region fallthrough
CT: control target
= control target key end

     0   :  { %8 = vsyncpa [#allocation4], 0  ;;  %s369_s0 = inlined_call_operand.hbm [shape: f32[16,32], index: 0, kind: input, shape index: {}]   ;;  %s370_s1 = inlined_call_operand.hbm [shape: f32[32,256], index: 1, kind: input, shape index: {}]   ;;  %s371_s2 = inlined_call_operand.vmem [shape: f32[1,256], index: 2, kind: input, shape index: {}]   ;;  %s372_s3 = inlined_call_operand.hbm [shape: f32[16,128], index: 3, kind: output, shape index: {}]  }
   0x1   :  { %9 = vsyncpa [#allocation7], 0 }
   0x2   :  { %10 = vsyncpa [#allocation5], 0  ;;  %s296_s12 = smov [#allocation3]   ;;  %s224_s16 = scalar_lea.hbm %s369_s0, 256 }
   0x3   :  { %s16_s13 = sshll.u32 %s296_s12, 4  ;;  %p225_p0 = scmp.ne.s32.totalorder %s369_s0, %s224_s16  ;;  %s17_s13 = int_to_ptr.vmem [resolvable:$true] %s16_s13 }
   0x4   :  { %p228_p1 = scmp.lt.u32.totalorder %s224_s16, %s369_s0 }
   0x6   :  { %p230_p2 = pnand %p228_p1, %p225_p0 }
   0x8   :  { %233 = shalt.err (!%p230_p2)
}
   0x9   :  { %s234_s21 = scalar_lea.vmem %s17_s13, 256  ;;  %p239_p4 = scmp.lt.s32.totalorder %s17_s13, %s17_s13 }
   0xa   :  { %p235_p3 = scmp.ne.s32.totalorder %s17_s13, %s234_s21  ;;  %p240_p5 = scmp.lt.s32.totalorder %s234_s21, %s234_s21 }
   0xc   :  { %p241_p6 = por %p240_p5, %p239_p4 }
   0xe   :  { %p242_p7 = pnand %p241_p6, %p235_p3 }
  0x10   :  { %245 = shalt.err (!%p242_p7)
}
  0x11   :  { %s297_s22 = smov 128   ;;  %s298_s23 = smov 8  }
  0x12   :  { %22 = dma.hbm_to_vmem [thread:$0]  %s369_s0, 256, %s17_s13, [#allocation4], %s297_s22, %s297_s22, %s298_s23  }
  0x13   :  { %s299_s26 = smov [#allocation6]   ;;  %s246_s30 = scalar_lea.hbm %s370_s1, 1024 }
  0x14   :  { %s28_s27 = sshll.u32 %s299_s26, 4  ;;  %p247_p8 = scmp.ne.s32.totalorder %s370_s1, %s246_s30  ;;  %s29_s27 = int_to_ptr.vmem [resolvable:$true] %s28_s27 }
  0x15   :  { %p250_p9 = scmp.lt.u32.totalorder %s246_s30, %s370_s1 }
  0x17   :  { %p252_p10 = pnand %p250_p9, %p247_p8 }
  0x19   :  { %255 = shalt.err (!%p252_p10)
}
  0x1a   :  { %s256_s8 = scalar_lea.vmem %s29_s27, 1024  ;;  %p261_p12 = scmp.lt.s32.totalorder %s29_s27, %s29_s27 }
  0x1b   :  { %p257_p11 = scmp.ne.s32.totalorder %s29_s27, %s256_s8  ;;  %p262_p13 = scmp.lt.s32.totalorder %s256_s8, %s256_s8 }
  0x1d   :  { %p263_p0 = por %p262_p13, %p261_p12 }
  0x1f   :  { %p264_p1 = pnand %p263_p0, %p257_p11 }
  0x21   :  { %267 = shalt.err (!%p264_p1)
}
  0x22   :  { %s300_s0 = smov 256   ;;  %s301_s9 = smov 16  }
  0x23   :  { %34 = dma.hbm_to_vmem [thread:$0]  %s370_s1, 1024, %s29_s27, [#allocation7], %s300_s0, %s300_s0, %s301_s9  }
  0x24   :  { %290 = dma.done.wait [#allocation4], 256  }
  0x25   :  { %291 = vsyncadd [#allocation4], 4294967040 }
  0x26   :  { %292 = dma.done.wait [#allocation7], 1024  }
  0x27   :  { %293 = vsyncadd [#allocation7], 4294966272  ;;  %v302_v0 = vmov 0.0   ;;  %v58_v1 = vld [vmem:[#allocation6 + $0x8] sm:$0xff]  ;;  %v60_v2 = vld [vmem:[#allocation6 + $0x18] sm:$0xff]  ;;  %vm65_vm0 = vcmask 261120   ;;  %v166_v15 = vlaneseq }
  0x28   :  { %136 = vmatprep.mubr.f32.mxu0 %v302_v0  ;;  %142 = vmatprep.mubr.f32.mxu1 %v302_v0  ;;  %v57_v3 = vld [vmem:[#allocation6] sm:$0xff]  ;;  %v204_v4 = vpack.c.bf16 %v60_v2, %v58_v1  ;;  %v59_v5 = vld [vmem:[#allocation6 + $0x10] sm:$0xff]  ;;  %v62_v6 = vld [vmem:[#allocation6 + $0x28] sm:$0xff]  ;;  %s303_s13 = smov [#allocation8]  }
  0x29   :  { %v64_v7 = vld [vmem:[#allocation6 + $0x38] sm:$0xff]  ;;  %v206_v8 = vpack.c.bf16 %v59_v5, %v57_v3  ;;  %v61_v10 = vld [vmem:[#allocation6 + $0x20] sm:$0xff]  ;;  %v63_v11 = vld [vmem:[#allocation6 + $0x30] sm:$0xff]  ;;  %v167_v16 = vshrl.u32 %v166_v15, 7  ;;  %s189_s14 = sshll.u32 %s303_s13, 4  ;;  %s190_s14 = int_to_ptr.vmem [resolvable:$true] %s189_s14 }
  0x2a   :  { %v208_v9 = vpack.c.bf16 %v64_v7, %v62_v6  ;;  %205 = vmatprep.subr.bf16.mxu0 %v204_v4  ;;  %212 = vmatprep.subr.bf16.mxu1 %v204_v4  ;;  %v210_v12 = vpack.c.bf16 %v63_v11, %v61_v10  ;;  %v55_v13 = vld [vmem:[#allocation3] sm:$0xff]  ;;  %v56_v14 = vld [vmem:[#allocation3 + $0x8] sm:$0xff]  ;;  %s268_s15 = scalar_lea.vmem %s190_s14, 256  ;;  %p273_p3 = scmp.lt.s32.totalorder %s190_s14, %s190_s14 }
  0x2b   :  { %207 = vmatpush1.bf16.msra.mxu0 %v206_v8  ;;  %214 = vmatpush1.bf16.msra.mxu1 %v206_v8  ;;  %v168_v17 = vsub.s32 0, %v167_v16  ;;  %v164_v18 = vld [vmem:[%s371_s2] sm:$0x3]  ;;  %v172_v19 = vsub.s32 1, %v167_v16  ;;  %p269_p2 = scmp.ne.s32.totalorder %s190_s14, %s268_s15  ;;  %p274_p4 = scmp.lt.s32.totalorder %s268_s15, %s268_s15 }
  0x2c   :  { %209 = vmatprep.subr.bf16.mxu0 %v208_v9  ;;  %213 = vmatprep.subr.bf16.mxu1 %v208_v9 }
  0x2d   :  { %v169_v20 = vrot.slane %v164_v18, %v168_v17  ;;  %v173_v21 = vrot.slane %v164_v18, %v172_v19  ;;  %p275_p5 = por %p274_p4, %p273_p3 }
  0x2f   :  { %211 = vmatpush1.bf16.msra.mxu0 %v210_v12  ;;  %215 = vmatpush1.bf16.msra.mxu1 %v210_v12  ;;  %p276_p6 = pnand %p275_p5, %p269_p2 }
  0x32   :  { %202 = vmatmul.mubr.msk.f32.vlgmr.msra.gmra.mrb[0].mxu0 %vm65_vm0, %v55_v13  ;;  %203 = vmatmul.mubr.msk.f32.vlgmr.msra.gmra.mrb[0].mxu1 %vm65_vm0, %v56_v14 }
 0x105   :  { %v138_v22 = vpop.f32.mrb[0].mxu0  ;;  %v144_v23 = vpop.f32.mrb[0].mxu1 }
 0x106   :  { %v176_v24 = vadd.f32 %v169_v20, %v138_v22  ;;  %v178_v25 = vadd.f32 %v169_v20, %v144_v23  ;;  %v140_v26 = vpop.f32.mrb[1].mxu0  ;;  %v146_v27 = vpop.f32.mrb[1].mxu1 }
 0x107   :  { %v177_v28 = vadd.f32 %v173_v21, %v140_v26  ;;  %v179_v29 = vadd.f32 %v173_v21, %v146_v27 }
 0x109   :  { %v180_v30 = vmax.f32 %v176_v24, %v177_v28  ;;  %v181_v31 = vmax.f32 %v178_v25, %v179_v29 }
 0x10b   :  { %182 = vst [vmem:[#allocation8] sm:$0xff] %v180_v30  ;;  %183 = vst [vmem:[#allocation8 + $0x8] sm:$0xff] %v181_v31 }
 0x10c   :  { %279 = shalt.err (!%p276_p6)
}
 0x10d   :  { %s280_s17 = scalar_lea.hbm %s372_s3, 256 }
 0x10e   :  { %p281_p7 = scmp.ne.s32.totalorder %s372_s3, %s280_s17  ;;  %p284_p8 = scmp.lt.u32.totalorder %s280_s17, %s372_s3 }
 0x110   :  { %p286_p9 = pnand %p284_p8, %p281_p7 }
 0x112   :  { %289 = shalt.err (!%p286_p9)
}
 0x113   :  { %195 = dma.vmem_to_hbm [thread:$0]  %s190_s14, 256, %s372_s3, [#allocation5], %s297_s22, %s297_s22, %s298_s23  }
 0x114   :  { %294 = dma.done.wait [#allocation5], 256  }
 0x115   :  { %295 = vsyncadd [#allocation5], 4294967040 }
 0x116   :  { %199 = vsyncpa [#allocation4], 1 }
 0x117   :  { %200 = vsyncpa [#allocation7], 1 }
 0x118   :  { %201 = vsyncpa [#allocation5], 1 }

</bundles_post_ra>
